<compile_context>
chip_gen: v6e
topology: v6e:2x2x1
jax: 0.10.0
libtpu: 0.0.40
codegen_flags: <defaults>
</compile_context>

<pallas_src>
import functools

import jax
import jax.numpy as jnp
from jax.experimental import pallas as pl
from jax.experimental.pallas import tpu as pltpu


def _round_up(x: int, m: int) -> int:
    return ((x + m - 1) // m) * m


# ----------------------------------------------------------------------------
# Kernels
# ----------------------------------------------------------------------------
def _linear_kernel_acc_out(x_ref, w_ref, b_ref, o_ref, *, compute_dtype, precision):
    """f32 output: accumulate directly into the resident output block."""
    k = pl.program_id(2)

    @pl.when(k == 0)
    def _init():
        o_ref[...] = jnp.zeros_like(o_ref)

    o_ref[...] += jnp.dot(
        x_ref[...].astype(compute_dtype),
        w_ref[...].astype(compute_dtype),
        preferred_element_type=jnp.float32,
        precision=precision,
    )

    @pl.when(k == pl.num_programs(2) - 1)
    def _finalize():
        # Bias added once, in the finalize step only.
        o_ref[...] += b_ref[...]


def _linear_kernel_scratch(x_ref, w_ref, b_ref, o_ref, acc_ref, *, compute_dtype, precision):
    """Narrow (e.g. bf16) output: keep an f32 VMEM accumulator, downcast once."""
    k = pl.program_id(2)

    @pl.when(k == 0)
    def _init():
        acc_ref[...] = jnp.zeros_like(acc_ref)

    acc_ref[...] += jnp.dot(
        x_ref[...].astype(compute_dtype),
        w_ref[...].astype(compute_dtype),
        preferred_element_type=jnp.float32,
        precision=precision,
    )

    @pl.when(k == pl.num_programs(2) - 1)
    def _finalize():
        o_ref[...] = (acc_ref[...] + b_ref[...]).astype(o_ref.dtype)


# ----------------------------------------------------------------------------
# One-time (init-time) weight/bias preparation — hoisted out of the call path.
# ----------------------------------------------------------------------------
def prepare_linear(weight, bias=None, *, compute_dtype=None, max_tn=512, max_tk=512):
    """Transpose + pad the weight once; build the (1, N_pad) f32 bias row.

    weight: (out_features, in_features); bias: (out_features,) or None.
    Returns (w_kn, b_row, meta) where w_kn is (K_pad, N_pad), lane-dense in N.
    """
    N, K = weight.shape
    w_dtype = compute_dtype if compute_dtype is not None else weight.dtype
    N_pad = _round_up(N, 128)

    if K <= max_tk:
        # Full-K tile: lane dim of x block == full K, sublane dim of w block == full K.
        K_pad, tk = K, K
    else:
        K_pad = _round_up(K, 128)
        tk = max_tk - (max_tk % 128)
        while K_pad % tk != 0:   # tk must divide K_pad so the reduction never reads garbage
            tk -= 128
    tn = N_pad if N_pad <= max_tn else max_tn

    w_kn = jnp.pad(jnp.transpose(weight).astype(w_dtype),
                   ((0, K_pad - K), (0, N_pad - N)))
    if bias is None:
        b_row = jnp.zeros((1, N_pad), jnp.float32)
    else:
        b_row = jnp.pad(bias.astype(jnp.float32).reshape(1, N), ((0, 0), (0, N_pad - N)))

    meta = dict(N=N, K=K, N_pad=N_pad, K_pad=K_pad, tk=tk, tn=tn,
                compute_dtype=jnp.dtype(w_dtype))
    return w_kn, b_row, meta


# ----------------------------------------------------------------------------
# Forward call with cached params
# ----------------------------------------------------------------------------
def linear_apply(x, w_kn, b_row, meta, *, max_tm=512, precision=None, vmem_cap_bytes=None):
    *lead, K = x.shape
    assert K == meta["K"], "in_features mismatch"
    M = 1
    for d in lead:
        M *= d
    x2 = x.reshape(M, K)

    N, N_pad = meta["N"], meta["N_pad"]
    K_pad, tk, tn = meta["K_pad"], meta["tk"], meta["tn"]
    compute_dtype = meta["compute_dtype"]
    out_dtype = x.dtype

    # Only pad K when it cannot be covered by a single full-K tile (rare).
    if K_pad != K:
        x2 = jnp.pad(x2, ((0, 0), (0, K_pad - K)))

    # M: full-dim tile for small M (grid_m == 1 -> each weight tile streamed once),
    # 512-row tiles otherwise; ragged last M block is masked on store (no M pad).
    tm = M if M <= max_tm else max_tm

    gm = pl.cdiv(M, tm)
    gn = pl.cdiv(N_pad, tn)
    gk = K_pad // tk
    grid = (gm, gn, gk)

    out_is_f32 = jnp.dtype(out_dtype) == jnp.dtype(jnp.float32)
    if out_is_f32:
        kernel = functools.partial(_linear_kernel_acc_out,
                                   compute_dtype=compute_dtype, precision=precision)
        scratch_shapes = []
    else:
        kernel = functools.partial(_linear_kernel_scratch,
                                   compute_dtype=compute_dtype, precision=precision)
        scratch_shapes = [pltpu.VMEM((tm, tn), jnp.float32)]

    # --- generation-aware VMEM limit sized from actual tile footprint ---
    x_item = jnp.dtype(x2.dtype).itemsize
    w_item = jnp.dtype(w_kn.dtype).itemsize
    o_item = jnp.dtype(out_dtype).itemsize
    tile_bytes = 2 * (tm * tk * x_item + tk * tn * w_item + tn * 4 + tm * tn * o_item)
    if not out_is_f32:
        tile_bytes += tm * tn * 4
    if vmem_cap_bytes is None:
        try:
            vmem_cap_bytes = int(pltpu.get_tpu_info().vmem_capacity_bytes)
        except Exception:
            vmem_cap_bytes = 64 * 1024 * 1024  # conservative: v7x physical per-TC
    vmem_limit = int(min(max(2 * tile_bytes, 16 * 1024 * 1024),
                         (vmem_cap_bytes * 3) // 4))

    # --- cost estimate reflecting actual tiled HBM traffic ---
    cost = pl.CostEstimate(
        flops=2 * M * K_pad * N_pad,
        transcendentals=0,
        bytes_accessed=int(x2.size * x_item * gn
                           + w_kn.size * w_item * gm
                           + b_row.size * 4 * gm
                           + M * N_pad * o_item),
    )

    out = pl.pallas_call(
        kernel,
        out_shape=jax.ShapeDtypeStruct((M, N_pad), out_dtype),
        grid_spec=pltpu.PrefetchScalarGridSpec(
            num_scalar_prefetch=0,
            grid=grid,
            in_specs=[
                pl.BlockSpec((tm, tk), lambda i, j, k: (i, k)),   # x tile
                pl.BlockSpec((tk, tn), lambda i, j, k: (k, j)),   # W.T tile (lane-dense N)
                pl.BlockSpec((1, tn), lambda i, j, k: (0, j)),    # bias row
            ],
            out_specs=pl.BlockSpec((tm, tn), lambda i, j, k: (i, j)),
            scratch_shapes=scratch_shapes,
        ),
        compiler_params=pltpu.CompilerParams(
            dimension_semantics=("parallel", "parallel", "arbitrary"),
            vmem_limit_bytes=vmem_limit,
        ),
        cost_estimate=cost,
    )(x2, w_kn, b_row)

    if N_pad != N:
        out = out[:, :N]
    return out.reshape(*lead, N)


def linear_pallas(x, weight, bias=None, *, compute_dtype=None, max_tm=512,
                  max_tn=512, max_tk=512, precision=None):
    """One-off convenience wrapper (prep + apply). Prefer LinearPallas for reuse."""
    w_kn, b_row, meta = prepare_linear(weight, bias, compute_dtype=compute_dtype,
                                       max_tn=max_tn, max_tk=max_tk)
    return linear_apply(x, w_kn, b_row, meta, max_tm=max_tm, precision=precision)


class LinearPallas:
    """Mirror of the PyTorch Linear module (torch.randn-style init).

    The transposed/padded weight and bias row are cached at construction time
    so the per-call path does no weight reshuffling.
    """

    def __init__(self, in_features: int, out_features: int, bias: bool = True, *,
                 key, compute_dtype=None, max_tm=512, max_tn=512, max_tk=512,
                 precision=None):
        kw, kb = jax.random.split(key)
        self.weight = jax.random.normal(kw, (out_features, in_features), dtype=jnp.float32)
        self.bias = (jax.random.normal(kb, (out_features,), dtype=jnp.float32)
                     if bias else None)
        self._max_tm = max_tm
        self._precision = precision
        self._w_kn, self._b_row, self._meta = prepare_linear(
            self.weight, self.bias, compute_dtype=compute_dtype,
            max_tn=max_tn, max_tk=max_tk)

    def __call__(self, x):
        return linear_apply(x, self._w_kn, self._b_row, self._meta,
                            max_tm=self._max_tm, precision=self._precision)


if __name__ == "__main__":
    key = jax.random.PRNGKey(0)
    k_x, k_params = jax.random.split(key)

    # Small shapes consistent with the module: batch=2, seq=8, hidden 32 -> 64.
    B, S, D_in, D_out = 2, 8, 32, 64

    x = jax.random.normal(k_x, (B, S, D_in), dtype=jnp.float32)

    # f32 path (matches the PyTorch module's forward semantics).
    lin = LinearPallas(D_in, D_out, bias=True, key=k_params)
    out = jax.block_until_ready(lin(x))

    ref = x @ lin.weight.T + lin.bias
    assert out.shape == (B, S, D_out)
    assert jnp.allclose(out, ref, atol=1e-3, rtol=1e-3)

    # bf16 MXU-operand path (weight cached in bf16, f32 accumulation) — looser tol.
    lin_bf16 = LinearPallas(D_in, D_out, bias=True, key=k_params,
                            compute_dtype=jnp.bfloat16)
    out_bf16 = jax.block_until_ready(lin_bf16(x))
    assert out_bf16.shape == (B, S, D_out)
    assert jnp.allclose(out_bf16, ref, atol=0.5, rtol=0.1)

    print("KERNEL_OK")
</pallas_src>

<mosaic_0001>
module attributes {stable_mosaic.version = 11 : i64} {
  func.func @_linear_kernel_acc_out(%arg0: i32, %arg1: i32, %arg2: i32, %arg3: memref<16x32xf32, #tpu.memory_space<vmem>>, %arg4: memref<32x128xf32, #tpu.memory_space<vmem>>, %arg5: memref<1x128xf32, #tpu.memory_space<vmem>>, %arg6: memref<16x128xf32, #tpu.memory_space<vmem>>) attributes {dimension_semantics = [#tpu.dimension_semantics<parallel>, #tpu.dimension_semantics<parallel>, #tpu.dimension_semantics<arbitrary>], iteration_bounds = array<i64: 1, 1, 1>, scalar_prefetch = 0 : i64, scratch_operands = 0 : i64, tpu.core_type = #tpu.core_type<tc>, window_params = [{transform_indices = @transform_0, window_bounds = array<i64: 16, 32>}, {transform_indices = @transform_1, window_bounds = array<i64: 32, 128>}, {transform_indices = @transform_2, window_bounds = array<i64: 1, 128>}, {transform_indices = @transform_3, window_bounds = array<i64: 16, 128>}]} {
    %c0_i32 = arith.constant 0 : i32
    %0 = arith.cmpi eq, %arg2, %c0_i32 : i32
    %1 = arith.extui %0 : i1 to i32
    %c0_i32_0 = arith.constant 0 : i32
    %2 = arith.cmpi ne, %1, %c0_i32_0 : i32
    scf.if %2 {
      %cst_10 = arith.constant 0.000000e+00 : f32
      %12 = vector.broadcast %cst_10 : f32 to vector<16x128xf32>
      %c0_11 = arith.constant 0 : index
      %c0_12 = arith.constant 0 : index
      %13 = vector.load %arg6[%c0_11, %c0_12] : memref<16x128xf32, #tpu.memory_space<vmem>>, vector<16x128xf32>
      tpu.vector_store %arg6[%c0_11, %c0_12], %12 {strides = array<i32>} : memref<16x128xf32, #tpu.memory_space<vmem>>, vector<16x128xf32>,
    } else {
    }
    %c0 = arith.constant 0 : index
    %c0_1 = arith.constant 0 : index
    %3 = vector.load %arg6[%c0, %c0_1] : memref<16x128xf32, #tpu.memory_space<vmem>>, vector<16x128xf32>
    %c0_2 = arith.constant 0 : index
    %c0_3 = arith.constant 0 : index
    %4 = vector.load %arg3[%c0_2, %c0_3] : memref<16x32xf32, #tpu.memory_space<vmem>>, vector<16x32xf32>
    %c0_4 = arith.constant 0 : index
    %c0_5 = arith.constant 0 : index
    %5 = vector.load %arg4[%c0_4, %c0_5] : memref<32x128xf32, #tpu.memory_space<vmem>>, vector<32x128xf32>
    %cst = arith.constant dense<0.000000e+00> : vector<16x128xf32>
    %6 = tpu.matmul %4, %5, %cst {dimension_numbers = #tpu.dot_dimension_numbers<[1], [0], [0], [1], [0, 0, 1, 1], [], []>} : vector<16x32xf32>, vector<32x128xf32>, vector<16x128xf32> -> vector<16x128xf32>
    %7 = arith.addf %3, %6 : vector<16x128xf32>
    %c0_6 = arith.constant 0 : index
    %c0_7 = arith.constant 0 : index
    %8 = vector.load %arg6[%c0_6, %c0_7] : memref<16x128xf32, #tpu.memory_space<vmem>>, vector<16x128xf32>
    tpu.vector_store %arg6[%c0_6, %c0_7], %7 {strides = array<i32>} : memref<16x128xf32, #tpu.memory_space<vmem>>, vector<16x128xf32>,
    %c0_i32_8 = arith.constant 0 : i32
    %9 = arith.cmpi eq, %arg2, %c0_i32_8 : i32
    %10 = arith.extui %9 : i1 to i32
    %c0_i32_9 = arith.constant 0 : i32
    %11 = arith.cmpi ne, %10, %c0_i32_9 : i32
    scf.if %11 {
      %c0_10 = arith.constant 0 : index
      %c0_11 = arith.constant 0 : index
      %12 = vector.load %arg6[%c0_10, %c0_11] : memref<16x128xf32, #tpu.memory_space<vmem>>, vector<16x128xf32>
      %c0_12 = arith.constant 0 : index
      %c0_13 = arith.constant 0 : index
      %13 = vector.load %arg5[%c0_12, %c0_13] : memref<1x128xf32, #tpu.memory_space<vmem>>, vector<1x128xf32>
      %14 = vector.broadcast %13 : vector<1x128xf32> to vector<16x128xf32>
      %15 = arith.addf %12, %14 : vector<16x128xf32>
      %c0_14 = arith.constant 0 : index
      %c0_15 = arith.constant 0 : index
      %16 = vector.load %arg6[%c0_14, %c0_15] : memref<16x128xf32, #tpu.memory_space<vmem>>, vector<16x128xf32>
      tpu.vector_store %arg6[%c0_14, %c0_15], %15 {strides = array<i32>} : memref<16x128xf32, #tpu.memory_space<vmem>>, vector<16x128xf32>,
    } else {
    }
    return
  }
  func.func @transform_0(%arg0: i32, %arg1: i32, %arg2: i32) -> (i32, i32) {
    %c0_i32 = arith.constant 0 : i32
    return %arg0, %arg2 : i32, i32
  }
  func.func @transform_1(%arg0: i32, %arg1: i32, %arg2: i32) -> (i32, i32) {
    %c0_i32 = arith.constant 0 : i32
    return %arg2, %arg1 : i32, i32
  }
  func.func @transform_2(%arg0: i32, %arg1: i32, %arg2: i32) -> (i32, i32) {
    %c0_i32 = arith.constant 0 : i32
    %c0_i32_0 = arith.constant 0 : i32
    return %c0_i32, %arg1 : i32, i32
  }
  func.func @transform_3(%arg0: i32, %arg1: i32, %arg2: i32) -> (i32, i32) {
    %c0_i32 = arith.constant 0 : i32
    return %arg0, %arg1 : i32, i32
  }
}

</mosaic_0001>

<bundles_post_ra>
// kernel: tpu_custom_call.1
= control target key start
LH: loop header
LB: loop body
LE: loop exit
PB: predicated region body
PF: predicated region fallthrough
CT: control target
= control target key end

     0   :  { %8 = vsyncpa [#allocation3], 0  ;;  %s317_s0 = inlined_call_operand.hbm [shape: f32[16,32], index: 0, kind: input, shape index: {}]   ;;  %s318_s1 = inlined_call_operand.hbm [shape: f32[32,128], index: 1, kind: input, shape index: {}]   ;;  %s319_s2 = inlined_call_operand.vmem [shape: f32[1,128], index: 2, kind: input, shape index: {}]   ;;  %s320_s3 = inlined_call_operand.hbm [shape: f32[16,128], index: 3, kind: output, shape index: {}]  }
   0x1   :  { %9 = vsyncpa [#allocation6], 0 }
   0x2   :  { %10 = vsyncpa [#allocation4], 0  ;;  %s269_s12 = smov [#allocation2]  }
   0x3   :  { %s16_s13 = sshll.u32 %s269_s12, 4  ;;  %s17_s13 = int_to_ptr.vmem [resolvable:$true] %s16_s13 }
   0x4   :  { %s211_s14 = scalar_lea.vmem %s17_s13, 256  ;;  %p216_p1 = scmp.lt.s32.totalorder %s17_s13, %s17_s13 }
   0x5   :  { %p212_p0 = scmp.ne.s32.totalorder %s17_s13, %s211_s14  ;;  %p217_p2 = scmp.lt.s32.totalorder %s211_s14, %s211_s14 }
   0x7   :  { %p218_p3 = por %p217_p2, %p216_p1 }
   0x9   :  { %p219_p4 = pnand %p218_p3, %p212_p0 }
   0xb   :  { %222 = shalt.err (!%p219_p4)
}
   0xc   :  { %s270_s15 = smov 128   ;;  %s271_s16 = smov 8  }
   0xd   :  { %22 = dma.hbm_to_vmem [thread:$0]  %s317_s0, 256, %s17_s13, [#allocation3], %s270_s15, %s270_s15, %s271_s16  }
   0xe   :  { %s272_s19 = smov [#allocation5]  }
   0xf   :  { %s28_s20 = sshll.u32 %s272_s19, 4  ;;  %s29_s20 = int_to_ptr.vmem [resolvable:$true] %s28_s20 }
  0x10   :  { %s231_s21 = scalar_lea.vmem %s29_s20, 512  ;;  %p236_p6 = scmp.lt.s32.totalorder %s29_s20, %s29_s20 }
  0x11   :  { %p232_p5 = scmp.ne.s32.totalorder %s29_s20, %s231_s21  ;;  %p237_p7 = scmp.lt.s32.totalorder %s231_s21, %s231_s21 }
  0x13   :  { %p238_p8 = por %p237_p7, %p236_p6 }
  0x15   :  { %p239_p9 = pnand %p238_p8, %p232_p5 }
  0x17   :  { %242 = shalt.err (!%p239_p9)
}
  0x18   :  { %34 = dma.hbm_to_vmem [thread:$0]  %s318_s1, 512, %s29_s20, [#allocation6], %s270_s15, %s270_s15, %s271_s16  }
  0x19   :  { %263 = dma.done.wait [#allocation3], 256  }
  0x1a   :  { %264 = vsyncadd [#allocation3], 4294967040 }
  0x1b   :  { %265 = dma.done.wait [#allocation6], 512  }
  0x1c   :  { %266 = vsyncadd [#allocation6], 4294966784  ;;  %vm57_vm0 = vcmask 261120   ;;  %v56_v0 = vld [vmem:[#allocation5 + $0x18] sm:$0xff]  ;;  %v55_v1 = vld [vmem:[#allocation5 + $0x10] sm:$0xff]  ;;  %s273_s24 = smov [#allocation7]  }
  0x1d   :  { %186 = vmatprep.subr.mxu0 %v56_v0  ;;  %v51_v2 = vld [vmem:[#allocation2] sm:$0xff]  ;;  %v54_v3 = vld [vmem:[#allocation5 + $0x8] sm:$0xff]  ;;  %v53_v4 = vld [vmem:[#allocation5] sm:$0xff]  ;;  %s164_s25 = sshll.u32 %s273_s24, 4  ;;  %s165_s25 = int_to_ptr.vmem [resolvable:$true] %s164_s25 }
  0x1e   :  { %187 = vmatpush3.msra.mxu0 %v56_v0  ;;  %194 = vmatprep.mubr.msk.f32.mxu0 %vm57_vm0, %v51_v2  ;;  %v52_v5 = vld [vmem:[#allocation2 + $0x8] sm:$0xff]  ;;  %v179_v7 = vld [vmem:[%s319_s2] ss:$0 sm:$0xff]  ;;  %s243_s26 = scalar_lea.vmem %s165_s25, 256  ;;  %p248_p11 = scmp.lt.s32.totalorder %s165_s25, %s165_s25 }
  0x1f   :  { %188 = vmatprep.subr.mxu0 %v55_v1  ;;  %p244_p10 = scmp.ne.s32.totalorder %s165_s25, %s243_s26  ;;  %p249_p12 = scmp.lt.s32.totalorder %s243_s26, %s243_s26 }
  0x20   :  { %189 = vmatpush3.msra.mxu0 %v55_v1 }
  0x21   :  { %190 = vmatprep.subr.mxu0 %v54_v3  ;;  %p250_p13 = por %p249_p12, %p248_p11 }
  0x22   :  { %191 = vmatpush3.msra.mxu0 %v54_v3 }
  0x23   :  { %192 = vmatprep.subr.mxu0 %v53_v4  ;;  %p251_p0 = pnand %p250_p13, %p244_p10 }
  0x24   :  { %193 = vmatpush3.msra.mxu0 %v53_v4 }
  0x25   :  { %195 = vmatmul.mubr.msk.f32.vlgmr.msra.gmra.mxu0 %vm57_vm0, %v52_v5 }
  0xe5   :  { %v196_v6 = vpop.f32.mrf.mxu0 }
  0xe6   :  { %v156_v9 = vadd.f32 %v196_v6, %v179_v7 }
  0xe7   :  { %v130_v8 = vpop.f32.mrf.mxu0 }
  0xe8   :  { %v155_v10 = vadd.f32 %v179_v7, %v130_v8  ;;  %158 = vst [vmem:[#allocation7 + $0x8] sm:$0xff] %v156_v9 }
  0xea   :  { %157 = vst [vmem:[#allocation7] sm:$0xff] %v155_v10 }
  0xeb   :  { %254 = shalt.err (!%p251_p0)
}
  0xec   :  { %170 = dma.vmem_to_hbm [thread:$0]  %s165_s25, 256, %s320_s3, [#allocation4], %s270_s15, %s270_s15, %s271_s16  }
  0xed   :  { %267 = dma.done.wait [#allocation4], 256  }
  0xee   :  { %268 = vsyncadd [#allocation4], 4294967040 }
  0xef   :  { %174 = vsyncpa [#allocation3], 1 }
  0xf0   :  { %175 = vsyncpa [#allocation6], 1 }
  0xf1   :  { %176 = vsyncpa [#allocation4], 1 }

</bundles_post_ra>
